<compile_context>
chip_gen: v7x
topology: tpu7x:2x2x1
jax: 0.10.0
libtpu: 0.0.40
codegen_flags: <defaults>
</compile_context>

<pallas_src>
import functools

import jax
import jax.numpy as jnp
from jax.experimental import pallas as pl
from jax.experimental.pallas import tpu as pltpu


_EPS = 1e-24          # guards rsqrt against zero-norm rows (0/0 -> NaN in the naive form)
_LANE = 128
_SUBLANE = 8
_PHYS_VMEM_FALLBACK = 64 * 1024 * 1024   # v7x: smallest physical VMEM per TensorCore


# ----------------------------- VMEM / tile planning --------------------------------

def _round_up(x, m):
    return (x + m - 1) // m * m


def _physical_vmem_bytes():
    try:
        info = pltpu.get_tpu_info()
        cap = int(getattr(info, "vmem_capacity_bytes", 0) or 0)
        if cap > 0:
            return cap
    except Exception:
        pass
    return _PHYS_VMEM_FALLBACK


def _plan_tiles(n, d_pad, big_f32_streams, resident_bytes=0):
    """Pick (tile_rows, vmem_limit_bytes).

    vmem_limit = ~75% of physical VMEM (96 MiB on v5e/v6e's 128 MiB, 48 MiB on v7x's
    64 MiB).  tile_rows is a multiple of 8 (f32 sublane) -- or the exact batch when
    n <= 8 -- sized so `big_f32_streams` double-buffered (tile_rows, d_pad) f32 streams
    plus `resident_bytes` fit in ~75% of that limit (headroom for compiler scratch).
    When n > 8 the tile is capped at ceil(n/2) so the grid has >= 2 steps and both
    v7x TensorCores get work; single-TC v5e/v6e are unaffected.
    """
    phys = _physical_vmem_bytes()
    vmem_limit = phys * 3 // 4
    budget = vmem_limit * 3 // 4 - resident_bytes
    bytes_per_row = big_f32_streams * 2 * d_pad * 4      # streams x double-buffer x f32
    tm = (max(budget, 0) // bytes_per_row) // _SUBLANE * _SUBLANE
    if tm < _SUBLANE:
        # Very large D: even 8 rows bust the 75% budget; hand the compiler (almost) all
        # physical VMEM.  TODO(synk): block the D axis (two-pass row norms) instead.
        tm = _SUBLANE
        vmem_limit = phys * 15 // 16
    tm = min(tm, 2048)                                   # big tiles amortize per-step overhead
    if n <= _SUBLANE:
        return n, vmem_limit                             # full-batch block (exact dims are legal)
    tm = min(tm, _round_up(pl.cdiv(n, 2), _SUBLANE))     # >= 2 grid steps (v7x megacore)
    return max(tm, _SUBLANE), vmem_limit


# ----------------------------- Pallas kernels ---------------------------------------

def _pgd_init_kernel(scale_ref, noise_ref, bx_ref, out_ref):
    """adv0 = clamp(bx + normalize_l2(noise) * scale, 0, 1),  scale = rand() * eps."""
    n = noise_ref[...]
    inv_nrm = jax.lax.rsqrt(jnp.sum(n * n, axis=-1, keepdims=True) + _EPS)
    adv0 = bx_ref[...] + n * (inv_nrm * scale_ref[0])       # scale is an SMEM scalar
    out_ref[...] = jnp.clip(adv0, 0.0, 1.0)


def _pgd_fused_step_kernel(adv_ref, bx_ref, oh_ref, w_ref, wt_ref, b_ref, out_ref,
                           *, step_size, epsilon):
    """Fused: linear-model forward+backward (sum-reduced CE) and one PGD step.

    grad = d/d adv [ CE((adv*2-1) @ W + b, by, reduction='sum') ]  (never touches HBM)
    adv += step * normalize_l2(grad);  project into L2 ball(bx, eps);  clamp [0,1].
    """
    adv = adv_ref[...]                                       # (TM, Dp) f32
    # ---- forward: logits = (adv*2 - 1) @ W + b (W resident in VMEM) ----------------
    x = adv * 2.0 - 1.0
    logits = jnp.dot(x, w_ref[...], preferred_element_type=jnp.float32) + b_ref[...]
    # ---- backward of F.cross_entropy(logits, by, reduction='sum') ------------------
    m = jnp.max(logits, axis=-1, keepdims=True)
    e = jnp.exp(logits - m)
    p = e / jnp.sum(e, axis=-1, keepdims=True)
    dlogits = p - oh_ref[...]                                # (TM, K)
    # d loss / d adv = 2 * dlogits @ W^T   (factor 2 from x = adv*2-1; W^T resident)
    g = 2.0 * jnp.dot(dlogits, wt_ref[...], preferred_element_type=jnp.float32)
    # ---- PGD step with L2-normalized gradient ---------------------------------------
    g_inv = jax.lax.rsqrt(jnp.sum(g * g, axis=-1, keepdims=True) + _EPS)
    adv = adv + g * (step_size * g_inv)
    # ---- tensor_clamp_l2(adv, bx, eps) then clamp(0, 1) -----------------------------
    bx = bx_ref[...]
    diff = adv - bx
    dsq = jnp.sum(diff * diff, axis=-1, keepdims=True)
    d_inv = jax.lax.rsqrt(dsq + _EPS)                        # eps guard keeps both branches finite
    projected = bx + diff * (d_inv * epsilon)
    adv = jnp.where(dsq > epsilon * epsilon, projected, adv)
    out_ref[...] = jnp.clip(adv, 0.0, 1.0)


# ----------------------------- pallas_call wrappers ---------------------------------

def pgd_init(scale, noise2d, bx2d):
    n, d = bx2d.shape
    tm, vmem_limit = _plan_tiles(n, d, big_f32_streams=3)    # noise, bx, out
    spec = pl.BlockSpec((tm, d), lambda i: (i, 0))
    return pl.pallas_call(
        _pgd_init_kernel,
        out_shape=jax.ShapeDtypeStruct((n, d), jnp.float32),
        grid=(pl.cdiv(n, tm),),
        in_specs=[
            pl.BlockSpec(memory_space=pltpu.MemorySpace.SMEM),   # scale scalar
            spec,                                                # noise
            spec,                                                # bx
        ],
        out_specs=spec,
        compiler_params=pltpu.CompilerParams(
            dimension_semantics=("parallel",),
            vmem_limit_bytes=vmem_limit),
    )(scale, noise2d, bx2d)


def pgd_fused_step(adv2d, bx2d, onehot, w, wt, b, *, step_size, epsilon):
    n, d = bx2d.shape
    k = w.shape[1]
    resident = 16 * d * k + 64 * 1024                        # W + W^T (double-buffered f32) + slop
    tm, vmem_limit = _plan_tiles(n, d, big_f32_streams=3,    # adv, bx, out
                                 resident_bytes=resident)
    row_spec = pl.BlockSpec((tm, d), lambda i: (i, 0))
    kernel = functools.partial(_pgd_fused_step_kernel,
                               step_size=float(step_size), epsilon=float(epsilon))
    return pl.pallas_call(
        kernel,
        out_shape=jax.ShapeDtypeStruct((n, d), jnp.float32),
        grid=(pl.cdiv(n, tm),),
        in_specs=[
            row_spec,                                        # adv
            row_spec,                                        # bx
            pl.BlockSpec((tm, k), lambda i: (i, 0)),         # one-hot labels
            pl.BlockSpec((d, k), lambda i: (0, 0)),          # W   (VMEM-resident)
            pl.BlockSpec((k, d), lambda i: (0, 0)),          # W^T (VMEM-resident)
            pl.BlockSpec((1, k), lambda i: (0, 0)),          # bias
        ],
        out_specs=row_spec,
        input_output_aliases={0: 0},                         # adv updated in place
        compiler_params=pltpu.CompilerParams(
            dimension_semantics=("parallel",),
            vmem_limit_bytes=vmem_limit),
    )(adv2d, bx2d, onehot, w, wt, b)


# ----------------------------- PGD_l2 forward ----------------------------------------

@functools.partial(jax.jit, static_argnames=("epsilon", "num_steps", "step_size"))
def pgd_l2_forward(params, bx, by, key, *, epsilon, num_steps, step_size):
    N, C, H, W_img = bx.shape
    D = C * H * W_img
    Dp = _round_up(D, _LANE)                   # lane-aligned: unmasked full-lane stores

    bx2d = bx.reshape(N, D).astype(jnp.float32)
    w = params["W"].astype(jnp.float32)        # (D, K)
    if Dp != D:
        bx2d = jnp.pad(bx2d, ((0, 0), (0, Dp - D)))
        w = jnp.pad(w, ((0, Dp - D), (0, 0)))  # zero rows -> padded grad cols stay 0
    K = w.shape[1]
    wt = w.T                                   # (K, Dp), built once per forward call
    b = params["b"].reshape(1, K).astype(jnp.float32)
    onehot = jax.nn.one_hot(by, K, dtype=jnp.float32)

    k_noise, k_scale = jax.random.split(key)
    # TODO(synk): generate in-kernel via pltpu.prng_seed + stateful_normal to drop
    # this one-time N*D HBM round-trip.
    noise = jax.random.normal(k_noise, (N, D), jnp.float32)       # torch.randn(bx.size())
    if Dp != D:
        noise = jnp.pad(noise, ((0, 0), (0, Dp - D)))
    # device-side stand-in for np.random.rand() * epsilon, fed to the kernel via SMEM
    scale = jax.random.uniform(k_scale, (1,), jnp.float32) * epsilon

    adv = pgd_init(scale, noise, bx2d)                            # (bx + init_noise).clamp(0,1)
    for _ in range(num_steps):                                    # unrolled inside jit
        adv = pgd_fused_step(adv, bx2d, onehot, w, wt, b,
                             step_size=step_size, epsilon=epsilon)

    if Dp != D:
        adv = adv[:, :D]
    return adv.reshape(N, C, H, W_img)


# ----------------------------- pure-JAX reference (correctness check) ----------------

def _normalize_l2_rows(x2d):
    return x2d / jnp.sqrt(jnp.sum(x2d * x2d, axis=1, keepdims=True))


@functools.partial(jax.jit, static_argnames=("epsilon", "num_steps", "step_size"))
def pgd_l2_reference(params, bx, by, key, *, epsilon, num_steps, step_size):
    N = bx.shape[0]
    D = bx.size // N
    bx2d = bx.reshape(N, D).astype(jnp.float32)

    k_noise, k_scale = jax.random.split(key)
    noise = jax.random.normal(k_noise, (N, D), jnp.float32)
    scale = jax.random.uniform(k_scale, (1,), jnp.float32)[0] * epsilon
    adv = jnp.clip(bx2d + _normalize_l2_rows(noise) * scale, 0.0, 1.0)

    def loss_fn(a):
        logits = (a * 2.0 - 1.0) @ params["W"] + params["b"]
        logp = jax.nn.log_softmax(logits, axis=-1)
        return -jnp.sum(logp[jnp.arange(N), by])                  # reduction='sum'

    for _ in range(num_steps):
        g = _normalize_l2_rows(jax.grad(loss_fn)(adv))
        adv = adv + step_size * g
        diff = adv - bx2d
        dn = jnp.sqrt(jnp.sum(diff * diff, axis=1, keepdims=True))
        adv = jnp.where(dn > epsilon, bx2d + diff / dn * epsilon, adv)
        adv = jnp.clip(adv, 0.0, 1.0)
    return adv.reshape(bx.shape)


# ----------------------------- main ---------------------------------------------------

if __name__ == "__main__":
    key = jax.random.PRNGKey(0)
    k_bx, k_by, k_w, k_attack = jax.random.split(key, 4)

    N, C, H, W = 2, 4, 16, 16
    D = C * H * W
    NUM_CLASSES = 10

    bx = jax.random.uniform(k_bx, (N, C, H, W), jnp.float32)          # images in [0, 1]
    by = jax.random.randint(k_by, (N,), 0, NUM_CLASSES, jnp.int32)    # true labels

    params = {
        "W": 0.01 * jax.random.normal(k_w, (D, NUM_CLASSES), jnp.float32),
        "b": jnp.zeros((NUM_CLASSES,), jnp.float32),
    }

    adv_bx = pgd_l2_forward(params, bx, by, k_attack,
                            epsilon=1.0, num_steps=3, step_size=0.25)
    adv_bx = jax.block_until_ready(adv_bx)

    assert adv_bx.shape == (N, C, H, W)
    assert bool(jnp.all(jnp.isfinite(adv_bx)))
    assert bool(jnp.all(adv_bx >= 0.0)) and bool(jnp.all(adv_bx <= 1.0))
    # L2 constraint: ||adv - bx||_2 <= epsilon (+ tiny tolerance)
    dn = jnp.sqrt(jnp.sum((adv_bx - bx).reshape(N, -1) ** 2, axis=1))
    assert bool(jnp.all(dn <= 1.0 + 1e-4))
    # Cross-check fused kernel against the pure-JAX reference (loose tol: MXU vs XLA
    # matmul precision differences only perturb the normalized gradient direction).
    ref_bx = pgd_l2_reference(params, bx, by, k_attack,
                              epsilon=1.0, num_steps=3, step_size=0.25)
    assert bool(jnp.all(jnp.abs(adv_bx - ref_bx) <= 1e-2))

    print("KERNEL_OK")
</pallas_src>

<mosaic_0001>
module attributes {stable_mosaic.version = 11 : i64} {
  func.func @_pgd_init_kernel(%arg0: i32, %arg1: memref<1xf32, #tpu.memory_space<smem>>, %arg2: memref<2x1024xf32, #tpu.memory_space<vmem>>, %arg3: memref<2x1024xf32, #tpu.memory_space<vmem>>, %arg4: memref<2x1024xf32, #tpu.memory_space<vmem>>) attributes {dimension_semantics = [#tpu.dimension_semantics<parallel>], iteration_bounds = array<i64: 1>, scalar_prefetch = 0 : i64, scratch_operands = 0 : i64, tpu.core_type = #tpu.core_type<tc>, window_params = [{transform_indices = @transform_0, window_bounds = array<i64: 1>}, {transform_indices = @transform_1, window_bounds = array<i64: 2, 1024>}, {transform_indices = @transform_2, window_bounds = array<i64: 2, 1024>}, {transform_indices = @transform_3, window_bounds = array<i64: 2, 1024>}]} {
    %c0 = arith.constant 0 : index
    %c0_0 = arith.constant 0 : index
    %0 = vector.load %arg2[%c0, %c0_0] : memref<2x1024xf32, #tpu.memory_space<vmem>>, vector<2x1024xf32>
    %1 = arith.mulf %0, %0 : vector<2x1024xf32>
    %cst = arith.constant dense<0.000000e+00> : vector<2xf32>
    %2 = vector.multi_reduction <add>, %1, %cst [1] : vector<2x1024xf32> to vector<2xf32>
    %3 = vector.shape_cast %2 : vector<2xf32> to vector<2x1xf32>
    %cst_1 = arith.constant 1.000000e-24 : f32
    %4 = vector.broadcast %cst_1 : f32 to vector<2x1xf32>
    %5 = arith.addf %3, %4 : vector<2x1xf32>
    %6 = math.rsqrt %5 : vector<2x1xf32>
    %c0_2 = arith.constant 0 : index
    %c0_3 = arith.constant 0 : index
    %7 = vector.load %arg3[%c0_2, %c0_3] : memref<2x1024xf32, #tpu.memory_space<vmem>>, vector<2x1024xf32>
    %c0_4 = arith.constant 0 : index
    %8 = memref.load %arg1[%c0_4] : memref<1xf32, #tpu.memory_space<smem>>
    %9 = vector.broadcast %8 : f32 to vector<2x1xf32>
    %10 = arith.mulf %6, %9 : vector<2x1xf32>
    %11 = vector.broadcast %10 : vector<2x1xf32> to vector<2x1024xf32>
    %12 = arith.mulf %0, %11 : vector<2x1024xf32>
    %13 = arith.addf %7, %12 : vector<2x1024xf32>
    %cst_5 = arith.constant 0.000000e+00 : f32
    %cst_6 = arith.constant 1.000000e+00 : f32
    %14 = vector.broadcast %cst_5 : f32 to vector<2x1024xf32>
    %15 = arith.maximumf %14, %13 : vector<2x1024xf32>
    %16 = vector.broadcast %cst_6 : f32 to vector<2x1024xf32>
    %17 = arith.minimumf %16, %15 : vector<2x1024xf32>
    %c0_7 = arith.constant 0 : index
    %c0_8 = arith.constant 0 : index
    %18 = vector.load %arg4[%c0_7, %c0_8] : memref<2x1024xf32, #tpu.memory_space<vmem>>, vector<2x1024xf32>
    tpu.vector_store %arg4[%c0_7, %c0_8], %17 {strides = array<i32>} : memref<2x1024xf32, #tpu.memory_space<vmem>>, vector<2x1024xf32>,
    return
  }
  func.func @transform_0(%arg0: i32) -> i32 {
    %c0_i32 = arith.constant 0 : i32
    %c0_i32_0 = arith.constant 0 : i32
    return %c0_i32 : i32
  }
  func.func @transform_1(%arg0: i32) -> (i32, i32) {
    %c0_i32 = arith.constant 0 : i32
    %c0_i32_0 = arith.constant 0 : i32
    return %arg0, %c0_i32 : i32, i32
  }
  func.func @transform_2(%arg0: i32) -> (i32, i32) {
    %c0_i32 = arith.constant 0 : i32
    %c0_i32_0 = arith.constant 0 : i32
    return %arg0, %c0_i32 : i32, i32
  }
  func.func @transform_3(%arg0: i32) -> (i32, i32) {
    %c0_i32 = arith.constant 0 : i32
    %c0_i32_0 = arith.constant 0 : i32
    return %arg0, %c0_i32 : i32, i32
  }
}

module attributes {stable_mosaic.version = 11 : i64} {
  func.func @_pgd_fused_step_kernel(%arg0: i32, %arg1: memref<2x1024xf32, #tpu.memory_space<vmem>>, %arg2: memref<2x1024xf32, #tpu.memory_space<vmem>>, %arg3: memref<2x10xf32, #tpu.memory_space<vmem>>, %arg4: memref<1024x10xf32, #tpu.memory_space<vmem>>, %arg5: memref<10x1024xf32, #tpu.memory_space<vmem>>, %arg6: memref<1x10xf32, #tpu.memory_space<vmem>>, %arg7: memref<2x1024xf32, #tpu.memory_space<vmem>>) attributes {dimension_semantics = [#tpu.dimension_semantics<parallel>], iteration_bounds = array<i64: 1>, scalar_prefetch = 0 : i64, scratch_operands = 0 : i64, tpu.core_type = #tpu.core_type<tc>, window_params = [{transform_indices = @transform_0, window_bounds = array<i64: 2, 1024>}, {transform_indices = @transform_1, window_bounds = array<i64: 2, 1024>}, {transform_indices = @transform_2, window_bounds = array<i64: 2, 10>}, {pipeline_mode = #tpu.pipeline_mode<synchronous>, transform_indices = @transform_3, window_bounds = array<i64: 1024, 10>}, {pipeline_mode = #tpu.pipeline_mode<synchronous>, transform_indices = @transform_4, window_bounds = array<i64: 10, 1024>}, {pipeline_mode = #tpu.pipeline_mode<synchronous>, transform_indices = @transform_5, window_bounds = array<i64: 1, 10>}, {transform_indices = @transform_6, window_bounds = array<i64: 2, 1024>}]} {
    %c0 = arith.constant 0 : index
    %c0_0 = arith.constant 0 : index
    %0 = vector.load %arg1[%c0, %c0_0] : memref<2x1024xf32, #tpu.memory_space<vmem>>, vector<2x1024xf32>
    %cst = arith.constant 2.000000e+00 : f32
    %1 = vector.broadcast %cst : f32 to vector<2x1024xf32>
    %2 = arith.mulf %0, %1 : vector<2x1024xf32>
    %cst_1 = arith.constant 1.000000e+00 : f32
    %3 = vector.broadcast %cst_1 : f32 to vector<2x1024xf32>
    %4 = arith.subf %2, %3 : vector<2x1024xf32>
    %c0_2 = arith.constant 0 : index
    %c0_3 = arith.constant 0 : index
    %5 = vector.load %arg4[%c0_2, %c0_3] : memref<1024x10xf32, #tpu.memory_space<vmem>>, vector<1024x10xf32>
    %cst_4 = arith.constant dense<0.000000e+00> : vector<2x10xf32>
    %6 = tpu.matmul %4, %5, %cst_4 {dimension_numbers = #tpu.dot_dimension_numbers<[1], [0], [0], [1], [0, 0, 1, 1], [], []>} : vector<2x1024xf32>, vector<1024x10xf32>, vector<2x10xf32> -> vector<2x10xf32>
    %c0_5 = arith.constant 0 : index
    %c0_6 = arith.constant 0 : index
    %7 = vector.load %arg6[%c0_5, %c0_6] : memref<1x10xf32, #tpu.memory_space<vmem>>, vector<1x10xf32>
    %8 = vector.broadcast %7 : vector<1x10xf32> to vector<2x10xf32>
    %9 = arith.addf %6, %8 : vector<2x10xf32>
    %cst_7 = arith.constant dense<0xFF800000> : vector<2xf32>
    %10 = vector.multi_reduction <maximumf>, %9, %cst_7 [1] : vector<2x10xf32> to vector<2xf32>
    %11 = vector.shape_cast %10 : vector<2xf32> to vector<2x1xf32>
    %12 = vector.broadcast %11 : vector<2x1xf32> to vector<2x10xf32>
    %13 = arith.subf %9, %12 : vector<2x10xf32>
    %14 = math.exp %13 : vector<2x10xf32>
    %cst_8 = arith.constant dense<0.000000e+00> : vector<2xf32>
    %15 = vector.multi_reduction <add>, %14, %cst_8 [1] : vector<2x10xf32> to vector<2xf32>
    %16 = vector.shape_cast %15 : vector<2xf32> to vector<2x1xf32>
    %17 = vector.broadcast %16 : vector<2x1xf32> to vector<2x10xf32>
    %18 = arith.divf %14, %17 : vector<2x10xf32>
    %c0_9 = arith.constant 0 : index
    %c0_10 = arith.constant 0 : index
    %19 = vector.load %arg3[%c0_9, %c0_10] : memref<2x10xf32, #tpu.memory_space<vmem>>, vector<2x10xf32>
    %20 = arith.subf %18, %19 : vector<2x10xf32>
    %c0_11 = arith.constant 0 : index
    %c0_12 = arith.constant 0 : index
    %21 = vector.load %arg5[%c0_11, %c0_12] : memref<10x1024xf32, #tpu.memory_space<vmem>>, vector<10x1024xf32>
    %cst_13 = arith.constant dense<0.000000e+00> : vector<2x1024xf32>
    %22 = tpu.matmul %20, %21, %cst_13 {dimension_numbers = #tpu.dot_dimension_numbers<[1], [0], [0], [1], [0, 0, 1, 1], [], []>} : vector<2x10xf32>, vector<10x1024xf32>, vector<2x1024xf32> -> vector<2x1024xf32>
    %cst_14 = arith.constant 2.000000e+00 : f32
    %23 = vector.broadcast %cst_14 : f32 to vector<2x1024xf32>
    %24 = arith.mulf %23, %22 : vector<2x1024xf32>
    %25 = arith.mulf %24, %24 : vector<2x1024xf32>
    %cst_15 = arith.constant dense<0.000000e+00> : vector<2xf32>
    %26 = vector.multi_reduction <add>, %25, %cst_15 [1] : vector<2x1024xf32> to vector<2xf32>
    %27 = vector.shape_cast %26 : vector<2xf32> to vector<2x1xf32>
    %cst_16 = arith.constant 1.000000e-24 : f32
    %28 = vector.broadcast %cst_16 : f32 to vector<2x1xf32>
    %29 = arith.addf %27, %28 : vector<2x1xf32>
    %30 = math.rsqrt %29 : vector<2x1xf32>
    %cst_17 = arith.constant 2.500000e-01 : f32
    %31 = vector.broadcast %cst_17 : f32 to vector<2x1xf32>
    %32 = arith.mulf %31, %30 : vector<2x1xf32>
    %33 = vector.broadcast %32 : vector<2x1xf32> to vector<2x1024xf32>
    %34 = arith.mulf %24, %33 : vector<2x1024xf32>
    %35 = arith.addf %0, %34 : vector<2x1024xf32>
    %c0_18 = arith.constant 0 : index
    %c0_19 = arith.constant 0 : index
    %36 = vector.load %arg2[%c0_18, %c0_19] : memref<2x1024xf32, #tpu.memory_space<vmem>>, vector<2x1024xf32>
    %37 = arith.subf %35, %36 : vector<2x1024xf32>
    %38 = arith.mulf %37, %37 : vector<2x1024xf32>
    %cst_20 = arith.constant dense<0.000000e+00> : vector<2xf32>
    %39 = vector.multi_reduction <add>, %38, %cst_20 [1] : vector<2x1024xf32> to vector<2xf32>
    %40 = vector.shape_cast %39 : vector<2xf32> to vector<2x1xf32>
    %cst_21 = arith.constant 1.000000e-24 : f32
    %41 = vector.broadcast %cst_21 : f32 to vector<2x1xf32>
    %42 = arith.addf %40, %41 : vector<2x1xf32>
    %43 = math.rsqrt %42 : vector<2x1xf32>
    %cst_22 = arith.constant 1.000000e+00 : f32
    %44 = vector.broadcast %cst_22 : f32 to vector<2x1xf32>
    %45 = arith.mulf %43, %44 : vector<2x1xf32>
    %46 = vector.broadcast %45 : vector<2x1xf32> to vector<2x1024xf32>
    %47 = arith.mulf %37, %46 : vector<2x1024xf32>
    %48 = arith.addf %36, %47 : vector<2x1024xf32>
    %cst_23 = arith.constant 1.000000e+00 : f32
    %49 = vector.broadcast %cst_23 : f32 to vector<2x1xf32>
    %50 = arith.cmpf ogt, %40, %49 : vector<2x1xf32>
    %51 = vector.shape_cast %50 : vector<2x1xi1> to vector<2x1xi1>
    %52 = vector.broadcast %51 : vector<2x1xi1> to vector<2x1024xi1>
    %53 = arith.select %52, %48, %35 : vector<2x1024xi1>, vector<2x1024xf32>
    %cst_24 = arith.constant 0.000000e+00 : f32
    %cst_25 = arith.constant 1.000000e+00 : f32
    %54 = vector.broadcast %cst_24 : f32 to vector<2x1024xf32>
    %55 = arith.maximumf %54, %53 : vector<2x1024xf32>
    %56 = vector.broadcast %cst_25 : f32 to vector<2x1024xf32>
    %57 = arith.minimumf %56, %55 : vector<2x1024xf32>
    %c0_26 = arith.constant 0 : index
    %c0_27 = arith.constant 0 : index
    %58 = vector.load %arg7[%c0_26, %c0_27] : memref<2x1024xf32, #tpu.memory_space<vmem>>, vector<2x1024xf32>
    tpu.vector_store %arg7[%c0_26, %c0_27], %57 {strides = array<i32>} : memref<2x1024xf32, #tpu.memory_space<vmem>>, vector<2x1024xf32>,
    return
  }
  func.func @transform_0(%arg0: i32) -> (i32, i32) {
    %c0_i32 = arith.constant 0 : i32
    %c0_i32_0 = arith.constant 0 : i32
    return %arg0, %c0_i32 : i32, i32
  }
  func.func @transform_1(%arg0: i32) -> (i32, i32) {
    %c0_i32 = arith.constant 0 : i32
    %c0_i32_0 = arith.constant 0 : i32
    return %arg0, %c0_i32 : i32, i32
  }
  func.func @transform_2(%arg0: i32) -> (i32, i32) {
    %c0_i32 = arith.constant 0 : i32
    %c0_i32_0 = arith.constant 0 : i32
    return %arg0, %c0_i32 : i32, i32
  }
  func.func @transform_3(%arg0: i32) -> (i32, i32) {
    %c0_i32 = arith.constant 0 : i32
    %c0_i32_0 = arith.constant 0 : i32
    %c0_i32_1 = arith.constant 0 : i32
    return %c0_i32, %c0_i32_0 : i32, i32
  }
  func.func @transform_4(%arg0: i32) -> (i32, i32) {
    %c0_i32 = arith.constant 0 : i32
    %c0_i32_0 = arith.constant 0 : i32
    %c0_i32_1 = arith.constant 0 : i32
    return %c0_i32, %c0_i32_0 : i32, i32
  }
  func.func @transform_5(%arg0: i32) -> (i32, i32) {
    %c0_i32 = arith.constant 0 : i32
    %c0_i32_0 = arith.constant 0 : i32
    %c0_i32_1 = arith.constant 0 : i32
    return %c0_i32, %c0_i32_0 : i32, i32
  }
  func.func @transform_6(%arg0: i32) -> (i32, i32) {
    %c0_i32 = arith.constant 0 : i32
    %c0_i32_0 = arith.constant 0 : i32
    return %arg0, %c0_i32 : i32, i32
  }
}

</mosaic_0001>

<bundles_post_ra>
// kernel: pgd_l2_forward.4
= control target key start
LH: loop header
LB: loop body
LE: loop exit
PB: predicated region body
PF: predicated region fallthrough
CT: control target
= control target key end

     0   :  { %v25_v0 = vlaneseq  ;;  %v115_v2 = vmov 1983009808   ;;  %vm63_vm0 = vcmask 1041408   ;;  %v116_v37 = vmov 269488144   ;;  %s166_s1 = inlined_call_operand.vmem [shape: f32[2,1024], index: 1, kind: input, shape index: {}]   ;;  %s167_s0 = inlined_call_operand.<no memory space> [shape: f32[1], index: 0, kind: input, shape index: {}]   ;;  %s168_s2 = inlined_call_operand.vmem [shape: f32[2,1024], index: 2, kind: input, shape index: {}]   ;;  %s169_s3 = inlined_call_operand.vmem [shape: f32[2,1024], index: 3, kind: output, shape index: {}]  }
   0x1   :  { %v15_v1 = vld [vmem:[%s166_s1] sm:$0xff]  ;;  %v23_v3 = vunpack.c.l.s4 %v115_v2  ;;  %v16_v4 = vld [vmem:[%s166_s1 + $0x8] sm:$0xff]  ;;  %v90_v38 = vunpack.c.l.s4 %v116_v37  ;;  %v86_v40 = vstv %s167_s0 }
   0x2   :  { %v17_v5 = vmul.f32 %v15_v1, %v15_v1  ;;  %v26_v6 = vshrl.u32 %v25_v0, 7  ;;  %v18_v9 = vmul.f32 %v16_v4, %v16_v4  ;;  %v83_v45 = vld [vmem:[%s168_s2] sm:$0xff]  ;;  %v84_v46 = vld [vmem:[%s168_s2 + $0x8] sm:$0xff] }
   0x3   :  { %v24_v7 = vunpack.c.0.s8 %v23_v3  ;;  %v91_v39 = vunpack.c.0.s8 %v90_v38 }
   0x4   :  { %v21_v8 = vcombine.high %v17_v5, %v17_v5  ;;  %v38_v15 = vcombine.high %v18_v9, %v18_v9 }
   0x5   :  { %v27_v10 = vsub.s32 %v24_v7, %v26_v6  ;;  %v94_v41 = vsub.s32 %v91_v39, %v26_v6 }
   0x7   :  { %v28_v11 = vrot.slane %v17_v5, %v27_v10  ;;  %v35_v12 = vrot.slane %v21_v8, %v27_v10  ;;  %v45_v16 = vrot.slane %v18_v9, %v27_v10  ;;  %v52_v21 = vrot.slane %v38_v15, %v27_v10 }
   0x9   :  { %v36_v13 = vcombine.high %v28_v11, %v28_v11  ;;  %v37_v14 = vcombine.high %v35_v12, %v35_v12  ;;  %v64_v17 = vsel %vm63_vm0, %v28_v11, 0.0  ;;  %v67_v19 = vsel %vm63_vm0, %v35_v12, 0.0 }
   0xa   :  { %v53_v22 = vcombine.high %v45_v16, %v45_v16  ;;  %v71_v25 = vsel %vm63_vm0, %v45_v16, 0.0  ;;  %v54_v27 = vcombine.high %v52_v21, %v52_v21  ;;  %v75_v30 = vsel %vm63_vm0, %v52_v21, 0.0 }
   0xb   :  { %v65_v18 = vsel %vm63_vm0, %v36_v13, 0.0  ;;  %v69_v23 = vsel %vm63_vm0, %v37_v14, 0.0 }
   0xc   :  { %v66_v20 = vadd.f32 %v65_v18, %v64_v17  ;;  %v73_v28 = vsel %vm63_vm0, %v53_v22, 0.0  ;;  %v77_v32 = vsel %vm63_vm0, %v54_v27, 0.0 }
   0xe   :  { %v68_v24 = vadd.f32 %v67_v19, %v66_v20 }
  0x10   :  { %v70_v26 = vadd.f32 %v69_v23, %v68_v24 }
  0x12   :  { %v72_v29 = vadd.f32 %v71_v25, %v70_v26 }
  0x14   :  { %v74_v31 = vadd.f32 %v73_v28, %v72_v29 }
  0x16   :  { %v76_v33 = vadd.f32 %v75_v30, %v74_v31 }
  0x18   :  { %v78_v34 = vadd.f32 %v77_v32, %v76_v33 }
  0x1a   :  { %79 = vadd.xlane.f32.xlu0 %v78_v34 }
  0xa7   :  { %v80_v35 = vpop.xlane.xlu0 %79 }
  0xa8   :  { %v81_v36 = vadd.f32 1e-24, %v80_v35 }
  0xaa   :  { %113 = vrsqrt.f32 %v81_v36 }
  0xb4   :  { %v114_v42 = vpop.eup %113 }
  0xb5   :  { %v87_v43 = vmul.f32 %v114_v42, %v86_v40 }
  0xb7   :  { %v95_v44 = vrot.slane %v87_v43, %v94_v41 }
  0xb9   :  { %v97_v47 = vmul.f32 %v95_v44, %v15_v1  ;;  %v98_v48 = vmul.f32 %v95_v44, %v16_v4 }
  0xbb   :  { %v99_v49 = vadd.f32 %v97_v47, %v83_v45  ;;  %v100_v50 = vadd.f32 %v98_v48, %v84_v46 }
  0xbd   :  { %v101_v51 = vmax.f32 %v99_v49, 0.0  ;;  %v102_v52 = vmax.f32 %v100_v50, 0.0 }
  0xbf   :  { %v103_v53 = vmin.f32 %v101_v51, 1.0  ;;  %v104_v54 = vmin.f32 %v102_v52, 1.0 }
  0xc1   :  { %105 = vst [vmem:[%s169_s3] sm:$0xff] %v103_v53  ;;  %106 = vst [vmem:[%s169_s3 + $0x8] sm:$0xff] %v104_v54 }

// kernel: pgd_l2_forward.5
= control target key start
LH: loop header
LB: loop body
LE: loop exit
PB: predicated region body
PF: predicated region fallthrough
CT: control target
= control target key end

     0   :  { %v1487_v60 = vmov 1983009808   ;;  %v170_v62 = vlaneseq  ;;  %vm488_vm0 = vcmask 74752   ;;  %vm522_vm1 = vcmask 1041408   ;;  %s2075_s3 = inlined_call_operand.vmem [shape: f32[1024,10], index: 3, kind: input, shape index: {}]   ;;  %s2076_s0 = inlined_call_operand.vmem [shape: f32[2,1024], index: 0, kind: input, shape index: {}, may-alias: {0,6}]   ;;  %s2077_s5 = inlined_call_operand.vmem [shape: f32[1,10], index: 5, kind: input, shape index: {}]   ;;  %s2078_s4 = inlined_call_operand.vmem [shape: f32[10,1024], index: 4, kind: input, shape index: {}]   ;;  %s2079_s2 = inlined_call_operand.vmem [shape: f32[2,10], index: 2, kind: input, shape index: {}]   ;;  %s2080_s1 = inlined_call_operand.vmem [shape: f32[2,1024], index: 1, kind: input, shape index: {}]   ;;  %s2081_s6 = inlined_call_operand.vmem [shape: f32[2,1024], index: 6, kind: output, shape index: {}, may-alias: {0,6}]  }
   0x1   :  { %v45_v0 = vld [vmem:[%s2075_s3 + $0x80] sm:$0xff]  ;;  %v46_v1 = vld [vmem:[%s2075_s3 + $0x88] sm:$0xff]  ;;  %v47_v11 = vld [vmem:[%s2075_s3 + $0x90] sm:$0xff]  ;;  %v168_v61 = vunpack.c.l.s4 %v1487_v60  ;;  %vm1488_vm2 = vmmov 1   ;;  %vm518_vm4 = vcmask 80896  }
   0x2   :  { %v29_v2 = vld [vmem:[%s2075_s3] sm:$0xff]  ;;  %v1323_v3 = vpack.c.bf16 %v46_v1, %v45_v0  ;;  %v30_v4 = vld [vmem:[%s2075_s3 + $0x8] sm:$0xff]  ;;  %v48_v13 = vld [vmem:[%s2075_s3 + $0x98] sm:$0xff] }
   0x3   :  { %v77_v5 = vld [vmem:[%s2075_s3 + $0x180] sm:$0xff]  ;;  %v78_v6 = vld [vmem:[%s2075_s3 + $0x188] sm:$0xff]  ;;  %v1325_v7 = vpack.c.bf16 %v30_v4, %v29_v2  ;;  %v31_v14 = vld [vmem:[%s2075_s3 + $0x10] sm:$0xff]  ;;  %v1327_v16 = vpack.c.bf16 %v48_v13, %v47_v11  ;;  %v169_v11 = vunpack.c.0.s8 %v168_v61 }
   0x4   :  { %v1355_v8 = vpack.c.bf16 %v78_v6, %v77_v5  ;;  %v61_v9 = vld [vmem:[%s2075_s3 + $0x100] sm:$0xff]  ;;  %v62_v10 = vld [vmem:[%s2075_s3 + $0x108] sm:$0xff]  ;;  %1324 = vmatprep.subr.bf16.mxu0 %v1323_v3  ;;  %v32_v15 = vld [vmem:[%s2075_s3 + $0x18] sm:$0xff] }
   0x5   :  { %v1357_v12 = vpack.c.bf16 %v62_v10, %v61_v9  ;;  %1326 = vmatpush3.bf16.msra.mxu0 %v1325_v7  ;;  %v1329_v17 = vpack.c.bf16 %v32_v15, %v31_v14  ;;  %v79_v18 = vld [vmem:[%s2075_s3 + $0x190] sm:$0xff]  ;;  %v80_v19 = vld [vmem:[%s2075_s3 + $0x198] sm:$0xff]  ;;  %v49_v23 = vld [vmem:[%s2075_s3 + $0xa0] sm:$0xff] }
   0x6   :  { %1356 = vmatprep.subr.bf16.mxu1 %v1355_v8  ;;  %v63_v20 = vld [vmem:[%s2075_s3 + $0x110] sm:$0xff]  ;;  %v1359_v21 = vpack.c.bf16 %v80_v19, %v79_v18  ;;  %v64_v22 = vld [vmem:[%s2075_s3 + $0x118] sm:$0xff]  ;;  %v50_v24 = vld [vmem:[%s2075_s3 + $0xa8] sm:$0xff]  ;;  %1328 = vmatprep.subr.bf16.mxu0 %v1327_v16 }
   0x7   :  { %1358 = vmatpush3.bf16.msra.mxu1 %v1357_v12  ;;  %v1361_v25 = vpack.c.bf16 %v64_v22, %v63_v20  ;;  %v1331_v26 = vpack.c.bf16 %v50_v24, %v49_v23  ;;  %v33_v27 = vld [vmem:[%s2075_s3 + $0x20] sm:$0xff]  ;;  %v34_v28 = vld [vmem:[%s2075_s3 + $0x28] sm:$0xff]  ;;  %v51_v35 = vld [vmem:[%s2075_s3 + $0xb0] sm:$0xff]  ;;  %v1676_v12 = vshrl.u32 %v170_v62, 7 }
   0x8   :  { %v81_v29 = vld [vmem:[%s2075_s3 + $0x1a0] sm:$0xff]  ;;  %1360 = vmatprep.subr.bf16.mxu1 %v1359_v21  ;;  %v82_v30 = vld [vmem:[%s2075_s3 + $0x1a8] sm:$0xff]  ;;  %v1333_v33 = vpack.c.bf16 %v34_v28, %v33_v27  ;;  %v52_v36 = vld [vmem:[%s2075_s3 + $0xb8] sm:$0xff] }
   0x9   :  { %v65_v31 = vld [vmem:[%s2075_s3 + $0x120] sm:$0xff]  ;;  %v66_v32 = vld [vmem:[%s2075_s3 + $0x128] sm:$0xff]  ;;  %1330 = vmatpush3.bf16.msra.mxu0 %v1329_v17  ;;  %v1363_v34 = vpack.c.bf16 %v82_v30, %v81_v29  ;;  %v35_v37 = vld [vmem:[%s2075_s3 + $0x30] sm:$0xff]  ;;  %v1335_v39 = vpack.c.bf16 %v52_v36, %v51_v35  ;;  %v1714_v28 = vsub.s32 %v169_v11, %v1676_v12 }
   0xa   :  { %1332 = vmatprep.subr.bf16.mxu0 %v1331_v26  ;;  %v1365_v38 = vpack.c.bf16 %v66_v32, %v65_v31  ;;  %v36_v40 = vld [vmem:[%s2075_s3 + $0x38] sm:$0xff]  ;;  %v83_v41 = vld [vmem:[%s2075_s3 + $0x1b0] sm:$0xff]  ;;  %v53_v46 = vld [vmem:[%s2075_s3 + $0xc0] sm:$0xff] }
   0xb   :  { %1362 = vmatpush3.bf16.msra.mxu1 %v1361_v25  ;;  %v84_v42 = vld [vmem:[%s2075_s3 + $0x1b8] sm:$0xff]  ;;  %v67_v44 = vld [vmem:[%s2075_s3 + $0x130] sm:$0xff]  ;;  %v54_v47 = vld [vmem:[%s2075_s3 + $0xc8] sm:$0xff]  ;;  %v1337_v48 = vpack.c.bf16 %v36_v40, %v35_v37 }
   0xc   :  { %1364 = vmatprep.subr.bf16.mxu1 %v1363_v34  ;;  %v1367_v43 = vpack.c.bf16 %v84_v42, %v83_v41  ;;  %v68_v45 = vld [vmem:[%s2075_s3 + $0x138] sm:$0xff]  ;;  %v85_v49 = vld [vmem:[%s2075_s3 + $0x1c0] sm:$0xff]  ;;  %v86_v50 = vld [vmem:[%s2075_s3 + $0x1c8] sm:$0xff]  ;;  %v1339_v52 = vpack.c.bf16 %v54_v47, %v53_v46 }
   0xd   :  { %1334 = vmatpush3.bf16.msra.mxu0 %v1333_v33  ;;  %v1369_v51 = vpack.c.bf16 %v68_v45, %v67_v44  ;;  %v37_v53 = vld [vmem:[%s2075_s3 + $0x40] sm:$0xff]  ;;  %v38_v54 = vld [vmem:[%s2075_s3 + $0x48] sm:$0xff]  ;;  %v1371_v56 = vpack.c.bf16 %v86_v50, %v85_v49  ;;  %v55_v58 = vld [vmem:[%s2075_s3 + $0xd0] sm:$0xff] }
   0xe   :  { %1336 = vmatprep.subr.bf16.mxu0 %v1335_v39  ;;  %v69_v55 = vld [vmem:[%s2075_s3 + $0x140] sm:$0xff]  ;;  %v70_v57 = vld [vmem:[%s2075_s3 + $0x148] sm:$0xff]  ;;  %v56_v59 = vld [vmem:[%s2075_s3 + $0xd8] sm:$0xff]  ;;  %v1341_v1 = vpack.c.bf16 %v38_v54, %v37_v53 }
   0xf   :  { %1366 = vmatpush3.bf16.msra.mxu1 %v1365_v38  ;;  %v87_v63 = vld [vmem:[%s2075_s3 + $0x1d0] sm:$0xff]  ;;  %v88_v0 = vld [vmem:[%s2075_s3 + $0x1d8] sm:$0xff]  ;;  %v1373_v2 = vpack.c.bf16 %v70_v57, %v69_v55  ;;  %v1343_v3 = vpack.c.bf16 %v56_v59, %v55_v58  ;;  %v57_v9 = vld [vmem:[%s2075_s3 + $0xe0] sm:$0xff] }
  0x10   :  { %1368 = vmatprep.subr.bf16.mxu1 %v1367_v43  ;;  %v39_v4 = vld [vmem:[%s2075_s3 + $0x50] sm:$0xff]  ;;  %v40_v5 = vld [vmem:[%s2075_s3 + $0x58] sm:$0xff]  ;;  %v1375_v7 = vpack.c.bf16 %v88_v0, %v87_v63  ;;  %v58_v10 = vld [vmem:[%s2075_s3 + $0xe8] sm:$0xff] }
  0x11   :  { %1338 = vmatpush3.bf16.msra.mxu0 %v1337_v48  ;;  %v71_v6 = vld [vmem:[%s2075_s3 + $0x150] sm:$0xff]  ;;  %v72_v8 = vld [vmem:[%s2075_s3 + $0x158] sm:$0xff]  ;;  %v89_v13 = vld [vmem:[%s2075_s3 + $0x1e0] sm:$0xff]  ;;  %v1345_v15 = vpack.c.bf16 %v40_v5, %v39_v4  ;;  %v1347_v19 = vpack.c.bf16 %v58_v10, %v57_v9 }
  0x12   :  { %1340 = vmatprep.subr.bf16.mxu0 %v1339_v52  ;;  %v90_v14 = vld [vmem:[%s2075_s3 + $0x1e8] sm:$0xff]  ;;  %v41_v16 = vld [vmem:[%s2075_s3 + $0x60] sm:$0xff]  ;;  %v1377_v18 = vpack.c.bf16 %v72_v8, %v71_v6  ;;  %v59_v25 = vld [vmem:[%s2075_s3 + $0xf0] sm:$0xff] }
  0x13   :  { %1370 = vmatpush3.bf16.msra.mxu1 %v1369_v51  ;;  %v42_v17 = vld [vmem:[%s2075_s3 + $0x68] sm:$0xff]  ;;  %v73_v20 = vld [vmem:[%s2075_s3 + $0x160] sm:$0xff]  ;;  %v1379_v23 = vpack.c.bf16 %v90_v14, %v89_v13  ;;  %v60_v26 = vld [vmem:[%s2075_s3 + $0xf8] sm:$0xff] }
  0x14   :  { %1372 = vmatprep.subr.bf16.mxu1 %v1371_v56  ;;  %v1696_v21 = vld [vmem:[%s2076_s0] sm:$0xff]  ;;  %v1701_v22 = vld [vmem:[%s2076_s0 + $0x8] sm:$0xff]  ;;  %v91_v30 = vld [vmem:[%s2075_s3 + $0x1f0] sm:$0xff]  ;;  %v1349_v32 = vpack.c.bf16 %v42_v17, %v41_v16  ;;  %v1351_v36 = vpack.c.bf16 %v60_v26, %v59_v25 }
  0x15   :  { %1342 = vmatpush3.bf16.msra.mxu0 %v1341_v1  ;;  %v74_v24 = vld [vmem:[%s2075_s3 + $0x168] sm:$0xff]  ;;  %v25_v27 = vmul.f32 2.0, %v1696_v21  ;;  %v26_v29 = vmul.f32 2.0, %v1701_v22  ;;  %v92_v31 = vld [vmem:[%s2075_s3 + $0x1f8] sm:$0xff]  ;;  %v43_v37 = vld [vmem:[%s2075_s3 + $0x70] sm:$0xff] }
  0x16   :  { %1344 = vmatprep.subr.bf16.mxu0 %v1343_v3  ;;  %v1381_v35 = vpack.c.bf16 %v74_v24, %v73_v20  ;;  %v44_v38 = vld [vmem:[%s2075_s3 + $0x78] sm:$0xff]  ;;  %v75_v39 = vld [vmem:[%s2075_s3 + $0x170] sm:$0xff]  ;;  %v1383_v40 = vpack.c.bf16 %v92_v31, %v91_v30  ;;  %v109_v43 = vld [vmem:[%s2075_s3 + $0x280] sm:$0xff] }
  0x17   :  { %1374 = vmatpush3.bf16.msra.mxu1 %v1373_v2  ;;  %v1168_v33 = vadd.f32 -1.0, %v25_v27  ;;  %v1169_v34 = vadd.f32 -1.0, %v26_v29  ;;  %v76_v41 = vld [vmem:[%s2075_s3 + $0x178] sm:$0xff]  ;;  %v110_v44 = vld [vmem:[%s2075_s3 + $0x288] sm:$0xff]  ;;  %v141_v46 = vld [vmem:[%s2075_s3 + $0x380] sm:$0xff]  ;;  %v1353_v49 = vpack.c.bf16 %v44_v38, %v43_v37 }
  0x18   :  { %1376 = vmatprep.subr.bf16.mxu1 %v1375_v7  ;;  %v142_v47 = vld [vmem:[%s2075_s3 + $0x388] sm:$0xff]  ;;  %v1385_v52 = vpack.c.bf16 %v76_v41, %v75_v39  ;;  %v1387_v53 = vpack.c.bf16 %v110_v44, %v109_v43  ;;  %v93_v54 = vld [vmem:[%s2075_s3 + $0x200] sm:$0xff]  ;;  %v111_v60 = vld [vmem:[%s2075_s3 + $0x290] sm:$0xff] }
  0x19   :  { %1346 = vmatpush3.bf16.msra.mxu0 %v1345_v15  ;;  %v173_v42 = vrot.slane %v1168_v33, %v1714_v28  ;;  %v166_v45 = vcombine.high %v1168_v33, %v1168_v33  ;;  %v183_v48 = vcombine.high %v1169_v34, %v1169_v34  ;;  %v94_v55 = vld [vmem:[%s2075_s3 + $0x208] sm:$0xff]  ;;  %v125_v56 = vld [vmem:[%s2075_s3 + $0x300] sm:$0xff]  ;;  %v1419_v58 = vpack.c.bf16 %v142_v47, %v141_v46  ;;  %v112_v61 = vld [vmem:[%s2075_s3 + $0x298] sm:$0xff] }
  0x1a   :  { %1348 = vmatprep.subr.bf16.mxu0 %v1347_v19  ;;  %v126_v59 = vld [vmem:[%s2075_s3 + $0x308] sm:$0xff]  ;;  %v1768_v62 = vrot.slane %v1169_v34, %v1714_v28  ;;  %v143_v63 = vld [vmem:[%s2075_s3 + $0x390] sm:$0xff]  ;;  %v144_v0 = vld [vmem:[%s2075_s3 + $0x398] sm:$0xff]  ;;  %v1389_v2 = vpack.c.bf16 %v94_v55, %v93_v54  ;;  %v1391_v4 = vpack.c.bf16 %v112_v61, %v111_v60 }
  0x1b   :  { %1378 = vmatpush3.bf16.msra.mxu1 %v1377_v18  ;;  %v181_v50 = vcombine.high %v173_v42, %v173_v42  ;;  %v180_v51 = vrot.slane %v166_v45, %v1714_v28  ;;  %v1777_v1 = vrot.slane %v183_v48, %v1714_v28  ;;  %v1421_v3 = vpack.c.bf16 %v126_v59, %v125_v56  ;;  %v95_v5 = vld [vmem:[%s2075_s3 + $0x210] sm:$0xff]  ;;  %v96_v6 = vld [vmem:[%s2075_s3 + $0x218] sm:$0xff]  ;;  %v113_v10 = vld [vmem:[%s2075_s3 + $0x2a0] sm:$0xff] }
  0x1c   :  { %1380 = vmatprep.subr.bf16.mxu1 %v1379_v23  ;;  %v127_v7 = vld [vmem:[%s2075_s3 + $0x310] sm:$0xff]  ;;  %v1423_v8 = vpack.c.bf16 %v144_v0, %v143_v63  ;;  %v128_v9 = vld [vmem:[%s2075_s3 + $0x318] sm:$0xff]  ;;  %v114_v11 = vld [vmem:[%s2075_s3 + $0x2a8] sm:$0xff]  ;;  %v198_v13 = vcombine.high %v1768_v62, %v1768_v62  ;;  %v1393_v17 = vpack.c.bf16 %v96_v6, %v95_v5 }
  0x1d   :  { %1350 = vmatpush3.bf16.msra.mxu0 %v1349_v32  ;;  %272 = vmatprep.mubr.f32.mxu0 %v181_v50  ;;  %v182_v57 = vcombine.high %v180_v51, %v180_v51  ;;  %v145_v14 = vld [vmem:[%s2075_s3 + $0x3a0] sm:$0xff]  ;;  %v146_v15 = vld [vmem:[%s2075_s3 + $0x3a8] sm:$0xff]  ;;  %v199_v16 = vcombine.high %v1777_v1, %v1777_v1  ;;  %v1425_v18 = vpack.c.bf16 %v128_v9, %v127_v7  ;;  %v115_v27 = vld [vmem:[%s2075_s3 + $0x2b0] sm:$0xff] }
  0x1e   :  { %1352 = vmatprep.subr.bf16.mxu0 %v1351_v36  ;;  %v1395_v19 = vpack.c.bf16 %v114_v11, %v113_v10  ;;  %v97_v20 = vld [vmem:[%s2075_s3 + $0x220] sm:$0xff]  ;;  %v98_v23 = vld [vmem:[%s2075_s3 + $0x228] sm:$0xff]  ;;  %v1427_v25 = vpack.c.bf16 %v146_v15, %v145_v14  ;;  %v116_v29 = vld [vmem:[%s2075_s3 + $0x2b8] sm:$0xff] }
  0x1f   :  { %1382 = vmatpush3.bf16.msra.mxu1 %v1381_v35  ;;  %342 = vmatprep.mubr.f32.mxu1 %v182_v57  ;;  %v129_v24 = vld [vmem:[%s2075_s3 + $0x320] sm:$0xff]  ;;  %v130_v26 = vld [vmem:[%s2075_s3 + $0x328] sm:$0xff]  ;;  %v147_v30 = vld [vmem:[%s2075_s3 + $0x3b0] sm:$0xff]  ;;  %v1397_v32 = vpack.c.bf16 %v98_v23, %v97_v20  ;;  %v1399_v34 = vpack.c.bf16 %v116_v29, %v115_v27 }
  0x20   :  { %1384 = vmatprep.subr.bf16.mxu1 %v1383_v40  ;;  %v148_v31 = vld [vmem:[%s2075_s3 + $0x3b8] sm:$0xff]  ;;  %v1429_v33 = vpack.c.bf16 %v130_v26, %v129_v24  ;;  %v99_v35 = vld [vmem:[%s2075_s3 + $0x230] sm:$0xff]  ;;  %v117_v40 = vld [vmem:[%s2075_s3 + $0x2c0] sm:$0xff] }
  0x21   :  { %1354 = vmatpush3.bf16.msra.mxu0 %v1353_v49  ;;  %v100_v36 = vld [vmem:[%s2075_s3 + $0x238] sm:$0xff]  ;;  %v131_v37 = vld [vmem:[%s2075_s3 + $0x330] sm:$0xff]  ;;  %v1431_v38 = vpack.c.bf16 %v148_v31, %v147_v30  ;;  %v118_v41 = vld [vmem:[%s2075_s3 + $0x2c8] sm:$0xff] }
  0x22   :  { %1388 = vmatprep.subr.bf16.mxu0 %v1387_v53  ;;  %v132_v39 = vld [vmem:[%s2075_s3 + $0x338] sm:$0xff]  ;;  %v150_v43 = vld [vmem:[%s2075_s3 + $0x3c8] sm:$0xff]  ;;  %v1401_v44 = vpack.c.bf16 %v100_v36, %v99_v35  ;;  %v1403_v46 = vpack.c.bf16 %v118_v41, %v117_v40  ;;  %v101_v47 = vld [vmem:[%s2075_s3 + $0x240] sm:$0xff] }
  0x23   :  { %1386 = vmatpush3.bf16.msra.mxu1 %v1385_v52  ;;  %v1433_v45 = vpack.c.bf16 %v132_v39, %v131_v37  ;;  %v102_v48 = vld [vmem:[%s2075_s3 + $0x248] sm:$0xff]  ;;  %v133_v49 = vld [vmem:[%s2075_s3 + $0x340] sm:$0xff]  ;;  %v119_v52 = vld [vmem:[%s2075_s3 + $0x2d0] sm:$0xff] }
  0x24   :  { %1420 = vmatprep.subr.bf16.mxu1 %v1419_v58  ;;  %273 = vmatmul.mubr.f32.vlgmr.msra.gmra.mrb[0].mxu0 %v173_v42  ;;  %v149_v42 = vld [vmem:[%s2075_s3 + $0x3c0] sm:$0xff]  ;;  %v120_v53 = vld [vmem:[%s2075_s3 + $0x2d8] sm:$0xff]  ;;  %v151_v54 = vld [vmem:[%s2075_s3 + $0x3d0] sm:$0xff]  ;;  %v1405_v56 = vpack.c.bf16 %v102_v48, %v101_v47 }
  0x25   :  { %1390 = vmatpush3.bf16.msra.mxu0 %v1389_v2  ;;  %412 = vmatprep.mubr.f32.mxu0 %v198_v13  ;;  %v1435_v50 = vpack.c.bf16 %v150_v43, %v149_v42  ;;  %v152_v55 = vld [vmem:[%s2075_s3 + $0x3d8] sm:$0xff]  ;;  %v1407_v58 = vpack.c.bf16 %v120_v53, %v119_v52  ;;  %v103_v59 = vld [vmem:[%s2075_s3 + $0x250] sm:$0xff]  ;;  %v121_v2 = vld [vmem:[%s2075_s3 + $0x2e0] sm:$0xff] }
  0x26   :  { %343 = vmatmul.mubr.f32.vlgmr.msra.gmra.mrb[0].mxu1 %v180_v51  ;;  %1392 = vmatprep.subr.bf16.mxu0 %v1391_v4  ;;  %v134_v51 = vld [vmem:[%s2075_s3 + $0x348] sm:$0xff]  ;;  %v104_v60 = vld [vmem:[%s2075_s3 + $0x258] sm:$0xff]  ;;  %v135_v61 = vld [vmem:[%s2075_s3 + $0x350] sm:$0xff]  ;;  %v1439_v63 = vpack.c.bf16 %v152_v55, %v151_v54 }
  0x27   :  { %1422 = vmatpush3.bf16.msra.mxu1 %v1421_v3  ;;  %482 = vmatprep.mubr.f32.mxu1 %v199_v16  ;;  %v1437_v57 = vpack.c.bf16 %v134_v51, %v133_v49  ;;  %v136_v0 = vld [vmem:[%s2075_s3 + $0x358] sm:$0xff]  ;;  %v122_v3 = vld [vmem:[%s2075_s3 + $0x2e8] sm:$0xff]  ;;  %v153_v4 = vld [vmem:[%s2075_s3 + $0x3e0] sm:$0xff]  ;;  %v1409_v6 = vpack.c.bf16 %v104_v60, %v103_v59 }
  0x28   :  { %1424 = vmatprep.subr.bf16.mxu1 %v1423_v8  ;;  %v154_v5 = vld [vmem:[%s2075_s3 + $0x3e8] sm:$0xff]  ;;  %v1441_v7 = vpack.c.bf16 %v136_v0, %v135_v61  ;;  %v1411_v8 = vpack.c.bf16 %v122_v3, %v121_v2  ;;  %v105_v9 = vld [vmem:[%s2075_s3 + $0x260] sm:$0xff]  ;;  %v123_v15 = vld [vmem:[%s2075_s3 + $0x2f0] sm:$0xff] }
  0x29   :  { %1394 = vmatpush3.bf16.msra.mxu0 %v1393_v17  ;;  %v106_v10 = vld [vmem:[%s2075_s3 + $0x268] sm:$0xff]  ;;  %v137_v11 = vld [vmem:[%s2075_s3 + $0x360] sm:$0xff]  ;;  %v1443_v13 = vpack.c.bf16 %v154_v5, %v153_v4  ;;  %v124_v16 = vld [vmem:[%s2075_s3 + $0x2f8] sm:$0xff]  ;;  %v1489_v4 = vmov 0.0  }
  0x2a   :  { %1396 = vmatprep.subr.bf16.mxu0 %v1395_v19  ;;  %v138_v14 = vld [vmem:[%s2075_s3 + $0x368] sm:$0xff]  ;;  %v155_v17 = vld [vmem:[%s2075_s3 + $0x3f0] sm:$0xff]  ;;  %v1413_v19 = vpack.c.bf16 %v106_v10, %v105_v9  ;;  %v1415_v23 = vpack.c.bf16 %v124_v16, %v123_v15  ;;  %v140_v29 = vld [vmem:[%s2075_s3 + $0x378] sm:$0xff] }
  0x2b   :  { %1426 = vmatpush3.bf16.msra.mxu1 %v1425_v18  ;;  %v156_v18 = vld [vmem:[%s2075_s3 + $0x3f8] sm:$0xff]  ;;  %v1445_v20 = vpack.c.bf16 %v138_v14, %v137_v11  ;;  %v107_v24 = vld [vmem:[%s2075_s3 + $0x270] sm:$0xff]  ;;  %v503_v53 = vld [vmem:[%s2078_s4 + $0x8] sm:$0xff] }
  0x2c   :  { %1428 = vmatprep.subr.bf16.mxu1 %v1427_v25  ;;  %v108_v25 = vld [vmem:[%s2075_s3 + $0x278] sm:$0xff]  ;;  %v1447_v26 = vpack.c.bf16 %v156_v18, %v155_v17  ;;  %v139_v27 = vld [vmem:[%s2075_s3 + $0x370] sm:$0xff]  ;;  %v511_v54 = vld [vmem:[%s2078_s4 + $0x48] sm:$0x3] }
  0x2d   :  { %1398 = vmatpush3.bf16.msra.mxu0 %v1397_v32  ;;  %v1417_v30 = vpack.c.bf16 %v108_v25, %v107_v24  ;;  %v1449_v31 = vpack.c.bf16 %v140_v29, %v139_v27  ;;  %v505_v55 = vld [vmem:[%s2078_s4 + $0x18] sm:$0xff]  ;;  %v504_v59 = vld [vmem:[%s2078_s4 + $0x10] sm:$0xff]  ;;  %vm1963_vm3 = vmpackc.low %vm522_vm1, %vm1488_vm2 }
  0x2e   :  { %1400 = vmatprep.subr.bf16.mxu0 %v1399_v34  ;;  %v512_v0 = vld [vmem:[%s2078_s4 + $0x50] sm:$0x3]  ;;  %v507_v5 = vld [vmem:[%s2078_s4 + $0x28] sm:$0xff]  ;;  %v517_v9 = vld [vmem:[%s2078_s4 + $0x78] sm:$0x3] }
  0x2f   :  { %1430 = vmatpush3.bf16.msra.mxu1 %v1429_v33  ;;  %v1170_v33 = vld [vmem:[%s2077_s5] ss:$0 sm:$0xff]  ;;  %v1460_v3 = vpack.c.bf16 %v512_v0, %v504_v59  ;;  %v508_v15 = vld [vmem:[%s2078_s4 + $0x30] sm:$0xff] }
  0x30   :  { %1432 = vmatprep.subr.bf16.mxu1 %v1431_v38  ;;  %v514_v14 = vld [vmem:[%s2078_s4 + $0x60] sm:$0x3]  ;;  %v516_v16 = vld [vmem:[%s2078_s4 + $0x70] sm:$0x3] }
  0x31   :  { %1402 = vmatpush3.bf16.msra.mxu0 %v1401_v44  ;;  %v500_v18 = vld [vmem:[%s2079_s2] sm:$0x3] }
  0x32   :  { %1404 = vmatprep.subr.bf16.mxu0 %v1403_v46 }
  0x33   :  { %1434 = vmatpush3.bf16.msra.mxu1 %v1433_v45 }
  0x34   :  { %1436 = vmatprep.subr.bf16.mxu1 %v1435_v50 }
  0x35   :  { %1406 = vmatpush3.bf16.msra.mxu0 %v1405_v56  ;;  %v1451_v56 = vpack.c.bf16 %v511_v54, %v503_v53 }
  0x36   :  { %1408 = vmatprep.subr.bf16.mxu0 %v1407_v58  ;;  %v510_v58 = vld [vmem:[%s2078_s4 + $0x40] sm:$0x3] }
  0x37   :  { %1438 = vmatpush3.bf16.msra.mxu1 %v1437_v57  ;;  %v502_v57 = vld [vmem:[%s2078_s4] sm:$0xff] }
  0x38   :  { %1440 = vmatprep.subr.bf16.mxu1 %v1439_v63  ;;  %v1454_v61 = vpack.c.bf16 %v510_v58, %v502_v57  ;;  %v513_v63 = vld [vmem:[%s2078_s4 + $0x58] sm:$0x3] }
  0x39   :  { %1410 = vmatpush3.bf16.msra.mxu0 %v1409_v6  ;;  %v1457_v2 = vpack.c.bf16 %v513_v63, %v505_v55  ;;  %v515_v6 = vld [vmem:[%s2078_s4 + $0x68] sm:$0x3] }
  0x3a   :  { %1412 = vmatprep.subr.bf16.mxu0 %v1411_v8  ;;  %v509_v8 = vld [vmem:[%s2078_s4 + $0x38] sm:$0xff] }
  0x3b   :  { %1442 = vmatpush3.bf16.msra.mxu1 %v1441_v7  ;;  %v1463_v7 = vpack.c.bf16 %v515_v6, %v507_v5  ;;  %v1469_v10 = vpack.c.bf16 %v517_v9, %v509_v8 }
  0x3c   :  { %1444 = vmatprep.subr.bf16.mxu1 %v1443_v13  ;;  %v506_v13 = vld [vmem:[%s2078_s4 + $0x20] sm:$0xff] }
  0x3d   :  { %1414 = vmatpush3.bf16.msra.mxu0 %v1413_v19 }
  0x3e   :  { %1416 = vmatprep.subr.bf16.mxu0 %v1415_v23  ;;  %v1472_v23 = vpack.c.bf16 %v516_v16, %v508_v15 }
  0x3f   :  { %1446 = vmatpush3.bf16.msra.mxu1 %v1445_v20  ;;  %v1466_v20 = vpack.c.bf16 %v514_v14, %v506_v13 }
  0x40   :  { %1448 = vmatprep.subr.bf16.mxu1 %v1447_v26 }
  0x41   :  { %1418 = vmatpush3.bf16.msra.mxu0 %v1417_v30 }
  0x42   :  { %1453 = vmatprep.subr.msk.bf16.mxu0 %vm1963_vm3, %v1451_v56 }
  0x43   :  { %1450 = vmatpush3.bf16.msra.mxu1 %v1449_v31 }
  0x44   :  { %413 = vmatmul.mubr.f32.vlgmr.msra.gmra.mrb[2].mxu0 %v1768_v62  ;;  %1459 = vmatprep.subr.msk.bf16.mxu1 %vm1963_vm3, %v1457_v2 }
  0x45   :  { %1456 = vmatpush1.bf16.msk.msra.mxu0 %vm1963_vm3, %v1454_v61  ;;  %611 = vmatprep.mubr.f32.mxu0 %v1489_v4 }
  0x46   :  { %483 = vmatmul.mubr.f32.vlgmr.msra.gmra.mrb[2].mxu1 %v1777_v1  ;;  %1465 = vmatprep.subr.msk.bf16.mxu0 %vm1963_vm3, %v1463_v7 }
  0x47   :  { %682 = vmatprep.mubr.f32.mxu1 %v1489_v4  ;;  %1462 = vmatpush1.bf16.msk.msra.mxu1 %vm1963_vm3, %v1460_v3 }
  0x48   :  { %1471 = vmatprep.subr.msk.bf16.mxu1 %vm1963_vm3, %v1469_v10 }
  0xf7   :  { %v1215_v32 = vpop.f32.mrb[0].mxu0 }
  0xf8   :  { %v1216_v34 = vpop.f32.mrb[1].mxu0 }
  0xf9   :  { %v1250_v35 = vpop.f32.mrb[0].mxu1  ;;  %v1217_v36 = vadd.f32 %v1216_v34, %v1215_v32 }
  0xfa   :  { %v1251_v37 = vpop.f32.mrb[1].mxu1 }
  0xfb   :  { %v1252_v38 = vadd.f32 %v1251_v37, %v1250_v35  ;;  %v275_v39 = vadd.f32 %v1217_v36, %v1170_v33 }
  0xfd   :  { %v345_v40 = vadd.f32 %v1252_v38, %v275_v39 }
 0x117   :  { %v1285_v41 = vpop.f32.mrb[2].mxu0 }
 0x118   :  { %v1286_v42 = vpop.f32.mrb[3].mxu0 }
 0x119   :  { %v1320_v43 = vpop.f32.mrb[2].mxu1  ;;  %v1287_v44 = vadd.f32 %v1286_v42, %v1285_v41 }
 0x11a   :  { %v1321_v45 = vpop.f32.mrb[3].mxu1 }
 0x11b   :  { %v1322_v62 = vadd.f32 %v1321_v45, %v1320_v43  ;;  %v415_v46 = vadd.f32 %v1287_v44, %v345_v40 }
 0x11d   :  { %v485_v1 = vadd.f32 %v1322_v62, %v415_v46 }
 0x11f   :  { %v489_v47 = vsel %vm488_vm0, %v485_v1, -inf }
 0x120   :  { %490 = vmax.xlane.f32.xlu0 %v489_v47 }
 0x1ad   :  { %v491_v48 = vpop.xlane.xlu0 %490 }
 0x1ae   :  { %v492_v49 = vsub.f32 %v485_v1, %v491_v48 }
 0x1b0   :  { %v493_v50 = vmul.f32 1.442695, %v492_v49 }
 0x1b2   :  { %1479 = vpow2.f32 %v493_v50 }
 0x1bc   :  { %v1480_v51 = vpop.eup %1479 }
 0x1bd   :  { %v495_v52 = vsel %vm488_vm0, %v1480_v51, 0.0 }
 0x1be   :  { %496 = vadd.xlane.f32.xlu0 %v495_v52 }
 0x24b   :  { %v497_v11 = vpop.xlane.xlu0 %496 }
 0x24c   :  { %1481 = vrcp.f32 %v497_v11 }
 0x256   :  { %v1482_v17 = vpop.eup %1481 }
 0x257   :  { %v499_v19 = vmul.f32 %v1482_v17, %v1480_v51 }
 0x259   :  { %v501_v24 = vsub.f32 %v499_v19, %v500_v18 }
 0x25b   :  { %1173 = vmatmul.mubr.msk.f32.vlgmr.msra.gmra.mrb[4].mxu0 %vm518_vm4, %v501_v24  ;;  %1176 = vmatmul.mubr.msk.f32.vlgmr.msra.gmra.mrb[4].mxu1 %vm518_vm4, %v501_v24 }
 0x25c   :  { %1468 = vmatpush1.bf16.msk.msra.mxu0 %vm1963_vm3, %v1466_v20  ;;  %1474 = vmatpush1.bf16.msk.msra.mxu1 %vm1963_vm3, %v1472_v23 }
 0x25d   :  { %753 = vmatprep.mubr.f32.mxu0 %v1489_v4  ;;  %824 = vmatprep.mubr.f32.mxu1 %v1489_v4 }
 0x25f   :  { %1179 = vmatmul.mubr.msk.f32.vlgmr.msra.gmra.mrb[6].mxu0 %vm518_vm4, %v501_v24  ;;  %1182 = vmatmul.mubr.msk.f32.vlgmr.msra.gmra.mrb[6].mxu1 %vm518_vm4, %v501_v24 }
 0x32e   :  { %v613_v25 = vpop.f32.mrb[4].mxu0  ;;  %v684_v26 = vpop.f32.mrb[4].mxu1 }
 0x32f   :  { %v831_v27 = vmul.f32 2.0, %v613_v25  ;;  %v833_v29 = vmul.f32 2.0, %v684_v26  ;;  %v615_v30 = vpop.f32.mrb[5].mxu0  ;;  %v686_v31 = vpop.f32.mrb[5].mxu1  ;;  %v921_v26 = vld [vmem:[%s2080_s1] sm:$0xff] }
 0x330   :  { %v832_v32 = vmul.f32 2.0, %v615_v30  ;;  %v834_v33 = vmul.f32 2.0, %v686_v31 }
 0x331   :  { %v839_v34 = vmul.f32 %v831_v27, %v831_v27  ;;  %v841_v35 = vmul.f32 %v833_v29, %v833_v29 }
 0x332   :  { %v840_v36 = vmul.f32 %v832_v32, %v832_v32  ;;  %v755_v37 = vpop.f32.mrb[6].mxu0  ;;  %v826_v38 = vpop.f32.mrb[6].mxu1  ;;  %v842_v44 = vmul.f32 %v834_v33, %v834_v33 }
 0x333   :  { %v847_v39 = vsel %vm522_vm1, %v839_v34, 0.0  ;;  %v835_v40 = vmul.f32 2.0, %v755_v37  ;;  %v757_v41 = vpop.f32.mrb[7].mxu0  ;;  %v828_v42 = vpop.f32.mrb[7].mxu1  ;;  %v850_v46 = vsel %vm522_vm1, %v841_v35, 0.0  ;;  %v837_v47 = vmul.f32 2.0, %v826_v38 }
 0x334   :  { %v848_v43 = vsel %vm522_vm1, %v840_v36, 0.0  ;;  %v836_v45 = vmul.f32 2.0, %v757_v41  ;;  %v852_v49 = vsel %vm522_vm1, %v842_v44, 0.0  ;;  %v838_v51 = vmul.f32 2.0, %v828_v42 }
 0x335   :  { %v849_v62 = vadd.f32 %v848_v43, %v847_v39  ;;  %v843_v1 = vmul.f32 %v835_v40, %v835_v40  ;;  %v845_v54 = vmul.f32 %v837_v47, %v837_v47 }
 0x336   :  { %v844_v50 = vmul.f32 %v836_v45, %v836_v45  ;;  %v846_v57 = vmul.f32 %v838_v51, %v838_v51 }
 0x337   :  { %v851_v48 = vadd.f32 %v850_v46, %v849_v62  ;;  %v854_v53 = vsel %vm522_vm1, %v843_v1, 0.0  ;;  %v858_v59 = vsel %vm522_vm1, %v845_v54, 0.0 }
 0x338   :  { %v856_v56 = vsel %vm522_vm1, %v844_v50, 0.0  ;;  %v860_v61 = vsel %vm522_vm1, %v846_v57, 0.0 }
 0x339   :  { %v853_v52 = vadd.f32 %v852_v49, %v851_v48 }
 0x33b   :  { %v855_v55 = vadd.f32 %v854_v53, %v853_v52 }
 0x33d   :  { %v857_v58 = vadd.f32 %v856_v56, %v855_v55 }
 0x33f   :  { %v859_v60 = vadd.f32 %v858_v59, %v857_v58  ;;  %v1490_v58 = vmov 269488144  }
 0x340   :  { %v992_v59 = vunpack.c.l.s4 %v1490_v58 }
 0x341   :  { %v861_v63 = vadd.f32 %v860_v61, %v859_v60 }
 0x342   :  { %v993_v60 = vunpack.c.0.s8 %v992_v59 }
 0x343   :  { %862 = vadd.xlane.f32.xlu1 %v861_v63 }
 0x344   :  { %v996_v61 = vsub.s32 %v993_v60, %v1676_v12 }
 0x3d0   :  { %v863_v0 = vpop.xlane.xlu1 %862 }
 0x3d1   :  { %v864_v2 = vadd.f32 1e-24, %v863_v0 }
 0x3d3   :  { %1483 = vrsqrt.f32 %v864_v2 }
 0x3dd   :  { %v1484_v3 = vpop.eup %1483 }
 0x3de   :  { %v866_v4 = vmul.f32 0.25, %v1484_v3 }
 0x3e0   :  { %v867_v5 = vmul.f32 %v866_v4, %v831_v27  ;;  %v868_v6 = vmul.f32 %v866_v4, %v832_v32  ;;  %v869_v7 = vmul.f32 %v866_v4, %v833_v29  ;;  %v870_v8 = vmul.f32 %v866_v4, %v834_v33  ;;  %v922_v29 = vld [vmem:[%s2080_s1 + $0x8] sm:$0xff] }
 0x3e1   :  { %v871_v9 = vmul.f32 %v866_v4, %v835_v40  ;;  %v872_v10 = vmul.f32 %v866_v4, %v836_v45  ;;  %v873_v11 = vmul.f32 %v866_v4, %v837_v47  ;;  %v874_v13 = vmul.f32 %v866_v4, %v838_v51 }
 0x3e2   :  { %v883_v14 = vcombine.low %v867_v5, %v868_v6  ;;  %v884_v15 = vcombine.low %v869_v7, %v870_v8 }
 0x3e3   :  { %v900_v16 = vcombine.low %v871_v9, %v872_v10  ;;  %v901_v17 = vcombine.low %v873_v11, %v874_v13 }
 0x3e4   :  { %v891_v18 = vrot.slane %v883_v14, %v1714_v28  ;;  %v898_v19 = vrot.slane %v884_v15, %v1714_v28 }
 0x3e5   :  { %v908_v20 = vrot.slane %v900_v16, %v1714_v28  ;;  %v915_v23 = vrot.slane %v901_v17, %v1714_v28 }
 0x3e6   :  { %v899_v24 = vcombine.low %v891_v18, %v898_v19 }
 0x3e7   :  { %v916_v25 = vcombine.low %v908_v20, %v915_v23 }
 0x3e8   :  { %v919_v27 = vadd.f32 %v899_v24, %v1696_v21 }
 0x3e9   :  { %v920_v30 = vadd.f32 %v916_v25, %v1701_v22 }
 0x3ea   :  { %v923_v31 = vsub.f32 %v919_v27, %v921_v26  ;;  %v1052_v3 = vcombine.high %v919_v27, %v919_v27  ;;  %v1059_v6 = vrot.slane %v919_v27, %v1714_v28 }
 0x3eb   :  { %v924_v32 = vsub.f32 %v920_v30, %v922_v29  ;;  %v1069_v2 = vcombine.high %v920_v30, %v920_v30  ;;  %v1076_v7 = vrot.slane %v920_v30, %v1714_v28 }
 0x3ec   :  { %v925_v33 = vmul.f32 %v923_v31, %v923_v31  ;;  %v1066_v10 = vrot.slane %v1052_v3, %v1714_v28  ;;  %v1067_v16 = vcombine.high %v1059_v6, %v1059_v6 }
 0x3ed   :  { %v926_v34 = vmul.f32 %v924_v32, %v924_v32  ;;  %v1083_v11 = vrot.slane %v1069_v2, %v1714_v28  ;;  %v1084_v17 = vcombine.high %v1076_v7, %v1076_v7 }
 0x3ee   :  { %v929_v35 = vcombine.high %v925_v33, %v925_v33  ;;  %v936_v36 = vrot.slane %v925_v33, %v1714_v28  ;;  %v1068_v24 = vcombine.high %v1066_v10, %v1066_v10 }
 0x3ef   :  { %v946_v39 = vcombine.high %v926_v34, %v926_v34  ;;  %v953_v21 = vrot.slane %v926_v34, %v1714_v28  ;;  %v1085_v25 = vcombine.high %v1083_v11, %v1083_v11 }
 0x3f0   :  { %v943_v37 = vrot.slane %v929_v35, %v1714_v28  ;;  %v944_v38 = vcombine.high %v936_v36, %v936_v36  ;;  %v971_v41 = vsel %vm522_vm1, %v936_v36, 0.0 }
 0x3f1   :  { %v960_v45 = vrot.slane %v946_v39, %v1714_v28  ;;  %v961_v62 = vcombine.high %v953_v21, %v953_v21  ;;  %v978_v47 = vsel %vm522_vm1, %v953_v21, 0.0 }
 0x3f2   :  { %v945_v40 = vcombine.high %v943_v37, %v943_v37  ;;  %v972_v42 = vsel %vm522_vm1, %v944_v38, 0.0  ;;  %v974_v22 = vsel %vm522_vm1, %v943_v37, 0.0 }
 0x3f3   :  { %v973_v43 = vadd.f32 %v972_v42, %v971_v41  ;;  %v962_v49 = vcombine.high %v960_v45, %v960_v45  ;;  %v980_v50 = vsel %vm522_vm1, %v961_v62, 0.0  ;;  %v982_v52 = vsel %vm522_vm1, %v960_v45, 0.0 }
 0x3f4   :  { %v976_v46 = vsel %vm522_vm1, %v945_v40, 0.0 }
 0x3f5   :  { %v975_v44 = vadd.f32 %v974_v22, %v973_v43  ;;  %v984_v54 = vsel %vm522_vm1, %v962_v49, 0.0 }
 0x3f7   :  { %v977_v1 = vadd.f32 %v976_v46, %v975_v44 }
 0x3f9   :  { %v979_v48 = vadd.f32 %v978_v47, %v977_v1 }
 0x3fb   :  { %v981_v51 = vadd.f32 %v980_v50, %v979_v48 }
 0x3fd   :  { %v983_v53 = vadd.f32 %v982_v52, %v981_v51 }
 0x3ff   :  { %v985_v55 = vadd.f32 %v984_v54, %v983_v53 }
 0x401   :  { %986 = vadd.xlane.f32.xlu1 %v985_v55 }
 0x48e   :  { %v987_v56 = vpop.xlane.xlu1 %986 }
 0x48f   :  { %v988_v57 = vadd.f32 1e-24, %v987_v56  ;;  %vm1003_vm5 = vcmp.gt.f32.partialorder %v987_v56, 1.0 }
 0x491   :  { %1485 = vrsqrt.f32 %v988_v57 }
 0x49b   :  { %v1486_v63 = vpop.eup %1485 }
 0x49c   :  { %v997_v0 = vrot.slane %v1486_v63, %v996_v61 }
 0x49e   :  { %v999_v4 = vmul.f32 %v997_v0, %v923_v31  ;;  %v1000_v5 = vmul.f32 %v997_v0, %v924_v32 }
 0x4a0   :  { %v1001_v8 = vadd.f32 %v999_v4, %v921_v26  ;;  %v1002_v9 = vadd.f32 %v1000_v5, %v922_v29 }
 0x4a2   :  { %v1008_v13 = vcombine.high %v1001_v8, %v1001_v8  ;;  %v1015_v14 = vrot.slane %v1001_v8, %v1714_v28  ;;  %v1025_v12 = vcombine.high %v1002_v9, %v1002_v9  ;;  %v1032_v15 = vrot.slane %v1002_v9, %v1714_v28 }
 0x4a4   :  { %v1022_v18 = vrot.slane %v1008_v13, %v1714_v28  ;;  %v1023_v19 = vcombine.high %v1015_v14, %v1015_v14  ;;  %v1039_v20 = vrot.slane %v1025_v12, %v1714_v28  ;;  %v1040_v23 = vcombine.high %v1032_v15, %v1032_v15 }
 0x4a5   :  { %v1094_v26 = vsel %vm1003_vm5, %v1015_v14, %v1059_v6  ;;  %v1098_v27 = vsel %vm1003_vm5, %v1032_v15, %v1076_v7 }
 0x4a6   :  { %v1024_v29 = vcombine.high %v1022_v18, %v1022_v18  ;;  %v1041_v30 = vcombine.high %v1039_v20, %v1039_v20  ;;  %v1095_v31 = vsel %vm1003_vm5, %v1023_v19, %v1067_v16  ;;  %v1096_v32 = vsel %vm1003_vm5, %v1022_v18, %v1066_v10 }
 0x4a7   :  { %v1099_v33 = vsel %vm1003_vm5, %v1040_v23, %v1084_v17  ;;  %v1100_v34 = vsel %vm1003_vm5, %v1039_v20, %v1083_v11  ;;  %v1102_v35 = vmax.f32 %v1094_v26, 0.0  ;;  %v1103_v36 = vmax.f32 %v1095_v31, 0.0 }
 0x4a8   :  { %v1097_v37 = vsel %vm1003_vm5, %v1024_v29, %v1068_v24  ;;  %v1101_v38 = vsel %vm1003_vm5, %v1041_v30, %v1085_v25  ;;  %v1104_v39 = vmax.f32 %v1096_v32, 0.0  ;;  %v1106_v40 = vmax.f32 %v1098_v27, 0.0 }
 0x4a9   :  { %v1105_v21 = vmax.f32 %v1097_v37, 0.0  ;;  %v1107_v41 = vmax.f32 %v1099_v33, 0.0  ;;  %v1108_v42 = vmax.f32 %v1100_v34, 0.0  ;;  %v1109_v43 = vmax.f32 %v1101_v38, 0.0 }
 0x4aa   :  { %v1110_v22 = vmin.f32 %v1102_v35, 1.0  ;;  %v1111_v44 = vmin.f32 %v1103_v36, 1.0  ;;  %v1112_v45 = vmin.f32 %v1104_v39, 1.0  ;;  %v1114_v62 = vmin.f32 %v1106_v40, 1.0 }
 0x4ab   :  { %v1113_v46 = vmin.f32 %v1105_v21, 1.0  ;;  %v1115_v1 = vmin.f32 %v1107_v41, 1.0  ;;  %v1116_v47 = vmin.f32 %v1108_v42, 1.0  ;;  %v1117_v48 = vmin.f32 %v1109_v43, 1.0 }
 0x4ac   :  { %v1126_v49 = vcombine.low %v1110_v22, %v1111_v44 }
 0x4ad   :  { %v1127_v50 = vcombine.low %v1112_v45, %v1113_v46  ;;  %v1143_v51 = vcombine.low %v1114_v62, %v1115_v1  ;;  %v1144_v52 = vcombine.low %v1116_v47, %v1117_v48 }
 0x4ae   :  { %v1134_v53 = vrot.slane %v1126_v49, %v1714_v28 }
 0x4af   :  { %v1141_v54 = vrot.slane %v1127_v50, %v1714_v28  ;;  %v1151_v55 = vrot.slane %v1143_v51, %v1714_v28  ;;  %v1158_v56 = vrot.slane %v1144_v52, %v1714_v28 }
 0x4b1   :  { %v1142_v57 = vcombine.low %v1134_v53, %v1141_v54  ;;  %v1159_v58 = vcombine.low %v1151_v55, %v1158_v56 }
 0x4b3   :  { %1162 = vst [vmem:[%s2081_s6] sm:$0xff] %v1142_v57  ;;  %1163 = vst [vmem:[%s2081_s6 + $0x8] sm:$0xff] %v1159_v58 }

</bundles_post_ra>
